<compile_context>
chip_gen: v7x
topology: tpu7x:2x2x1
jax: 0.10.0
libtpu: 0.0.40
codegen_flags: <defaults>
</compile_context>

<pallas_src>
import functools

import jax
import jax.numpy as jnp
from jax.experimental import pallas as pl
from jax.experimental.pallas import tpu as pltpu


def _round_up(x, m):
    return ((x + m - 1) // m) * m


def _mha_center_kernel(x_ref, wq_ref, wkv_ref, wo_ref,
                       bq_ref, bkv_ref, bo_ref, hm_ref, hmt_ref,
                       o_ref, *, mid):
    W, TB, E = x_ref.shape
    H = hm_ref.shape[-1]

    x = x_ref[...]                                        # (W, TB, E) seq-first
    # TB is a multiple of 8, so collapsing the leading window dim is a
    # tile-aligned (relayout-free) reshape.
    x2 = x.reshape(W * TB, E)

    # ---- fused K/V projection: one wide (W*TB, E) @ (E, 2E) MXU matmul ----
    kv = jnp.dot(x2, wkv_ref[...],
                 preferred_element_type=jnp.float32) + bkv_ref[...]   # f32
    k = kv[:, :E].reshape(W, TB, E)
    v = kv[:, E:].reshape(W, TB, E)

    # ---- center-row query projection (1/sqrt(D) already folded in) --------
    q = jnp.dot(x[mid], wq_ref[...],
                preferred_element_type=jnp.float32) + bq_ref[...]     # (TB, E)

    # ---- per-head scores, kept lane-dense in E: VPU broadcast-multiply,
    #      then reduce each head's D lanes with a single (E, H) one-hot
    #      matmul (no per-head loops, no sub-lane slicing) ------------------
    qk = (q[None, :, :] * k).reshape(W * TB, E)
    s = jnp.dot(qk, hm_ref[...],
                preferred_element_type=jnp.float32).reshape(W, TB, H)

    # ---- numerically-stable softmax over the window axis (leading dim),
    #      accumulated with a static unroll over W (exactly W-1 VPU ops) ----
    m = s[0]
    for w in range(1, W):
        m = jnp.maximum(m, s[w])
    e = jnp.exp(s - m[None])
    denom = e[0]
    for w in range(1, W):
        denom = denom + e[w]
    p = e * pl.reciprocal(denom, approx=True)[None]        # (W, TB, H)

    # ---- broadcast head weights back across each head's D lanes with the
    #      transposed one-hot matmul, then reduce over the window -----------
    p_full = jnp.dot(p.reshape(W * TB, H), hmt_ref[...],
                     preferred_element_type=jnp.float32).reshape(W, TB, E)
    o = p_full[0] * v[0]
    for w in range(1, W):
        o = o + p_full[w] * v[w]                           # (TB, E) f32

    # ---- output projection -------------------------------------------------
    out = jnp.dot(o.astype(wo_ref.dtype), wo_ref[...],
                  preferred_element_type=jnp.float32) + bo_ref[...]
    o_ref[...] = out.astype(o_ref.dtype)


def _auto_block_b(B, W, E, H, itemsize, max_block=256,
                  budget_bytes=8 * 1024 * 1024):
    """Pick a batch tile TB (multiple of 8) that keeps the double-buffered
    input block plus fp32 in-kernel temporaries within a conservative VMEM
    budget (safe on v7x's 64 MiB as well as v5e/v6e's 128 MiB)."""
    per_row = 2 * W * E * itemsize + 4 * (W * (5 * E + 3 * H) + 8 * E)
    tb = budget_bytes // max(per_row, 1)
    tb = int(min(max_block, max(8, (tb // 8) * 8)))
    tb = min(tb, _round_up(B, 8))
    # v7x has 2 TensorCores: ensure >= 2 "parallel" grid steps when the batch
    # is big enough to split.
    if _round_up(B, tb) // tb < 2 and tb >= 16:
        tb = max(8, _round_up(pl.cdiv(B, 2), 8))
    return tb


def _vmem_limit_bytes(TB, W, E, H, itemsize, out_itemsize):
    x_buf = 2 * W * TB * E * itemsize                 # double-buffered input
    o_buf = 2 * TB * E * out_itemsize                 # double-buffered output
    w_buf = 2 * ((4 * E * E + 4 * E) * itemsize + 2 * E * H * 4)
    tmp = 4 * (W * TB * (5 * E + 3 * H) + 8 * TB * E)  # fp32 temporaries
    est = int(1.5 * (x_buf + o_buf + w_buf + tmp))
    return max(32 * 1024 * 1024, min(est, 64 * 1024 * 1024))


def center_aligned_attention(x, params, n_heads, *, compute_dtype=None,
                             max_block_b=256):
    """x: (B, W, E), W odd.  Returns (B, E), matching the PyTorch module
    (nn.MultiheadAttention queried at the center window position)."""
    B, W, E = x.shape
    assert W % 2 == 1, "Big window must be odd int"
    assert E % n_heads == 0, "d_model must be divisible by n_heads"
    mid = W // 2
    D = E // n_heads
    scale = 1.0 / float(D) ** 0.5

    cdt = jnp.dtype(compute_dtype) if compute_dtype is not None else x.dtype

    # ---- pack / pre-transpose weights once in XLA (outside the kernel) ----
    wq, wk, wv = jnp.split(params["in_proj_weight"], 3, axis=0)   # (E, E) each
    bq, bk, bv = jnp.split(params["in_proj_bias"], 3, axis=0)     # (E,) each
    wq_t = (wq.T * scale).astype(cdt)                             # scale folded in
    bq_s = (bq * scale).reshape(1, E).astype(cdt)
    wkv_t = jnp.concatenate([wk.T, wv.T], axis=1).astype(cdt)     # (E, 2E)
    bkv = jnp.concatenate([bk, bv]).reshape(1, 2 * E).astype(cdt)
    wo_t = params["out_proj_weight"].T.astype(cdt)                # (E, E)
    bo = params["out_proj_bias"].reshape(1, E).astype(cdt)

    # One-hot head map (E, H): hm[e, h] = 1 iff lane e belongs to head h.
    hm = (jnp.arange(E)[:, None] // D == jnp.arange(n_heads)[None, :]
          ).astype(jnp.float32)
    hm_t = hm.T                                                   # (H, E)

    # ---- batch tiling -------------------------------------------------------
    TB = _auto_block_b(B, W, E, n_heads, jnp.dtype(cdt).itemsize,
                       max_block=max_block_b)
    B_pad = _round_up(B, TB)

    # Seq-first (W, B, E) layout: the kernel's (W, TB, E) -> (W*TB, E)
    # collapse is then tile-aligned (TB % 8 == 0), feeding the fused matmul
    # without any in-kernel relayout.
    x_t = jnp.transpose(x, (1, 0, 2)).astype(cdt)
    if B_pad != B:
        x_t = jnp.pad(x_t, ((0, 0), (0, B_pad - B), (0, 0)))

    kernel = functools.partial(_mha_center_kernel, mid=mid)
    const2 = lambda b: (0, 0)

    out = pl.pallas_call(
        kernel,
        out_shape=jax.ShapeDtypeStruct((B_pad, E), x.dtype),
        grid=(B_pad // TB,),
        in_specs=[
            pl.BlockSpec((W, TB, E), lambda b: (0, b, 0)),   # x, TB batch rows
            pl.BlockSpec((E, E), const2),                    # Wq^T * scale
            pl.BlockSpec((E, 2 * E), const2),                # [Wk^T | Wv^T]
            pl.BlockSpec((E, E), const2),                    # Wo^T
            pl.BlockSpec((1, E), const2),                    # bq * scale
            pl.BlockSpec((1, 2 * E), const2),                # [bk | bv]
            pl.BlockSpec((1, E), const2),                    # bo
            pl.BlockSpec((E, n_heads), const2),              # head one-hot
            pl.BlockSpec((n_heads, E), const2),              # head one-hot^T
        ],
        out_specs=pl.BlockSpec((TB, E), lambda b: (b, 0)),
        compiler_params=pltpu.CompilerParams(
            dimension_semantics=("parallel",),
            vmem_limit_bytes=_vmem_limit_bytes(
                TB, W, E, n_heads, jnp.dtype(cdt).itemsize,
                jnp.dtype(x.dtype).itemsize)),
    )(x_t, wq_t, wkv_t, wo_t, bq_s, bkv, bo, hm, hm_t)
    return out[:B]


def reference(x, params, n_heads):
    """Pure-JAX reference matching torch.nn.MultiheadAttention semantics."""
    B, W, E = x.shape
    mid = W // 2
    D = E // n_heads
    wq, wk, wv = jnp.split(params["in_proj_weight"], 3, axis=0)
    bq, bk, bv = jnp.split(params["in_proj_bias"], 3, axis=0)
    q = x[:, mid, :] @ wq.T + bq                       # (B, E)
    k = x @ wk.T + bk                                  # (B, W, E)
    v = x @ wv.T + bv
    q = q.reshape(B, n_heads, 1, D)
    k = k.reshape(B, W, n_heads, D).transpose(0, 2, 1, 3)
    v = v.reshape(B, W, n_heads, D).transpose(0, 2, 1, 3)
    s = jnp.einsum("bhqd,bhkd->bhqk", q, k) / jnp.sqrt(jnp.float32(D))
    w = jax.nn.softmax(s, axis=-1)
    o = jnp.einsum("bhqk,bhkd->bhqd", w, v)            # (B, H, 1, D)
    o = o.transpose(0, 2, 1, 3).reshape(B, E)
    return o @ params["out_proj_weight"].T + params["out_proj_bias"]


if __name__ == "__main__":
    # Small deterministic config: batch=2, window=9 (odd), d_model=32, heads=4.
    B, W, E, H = 2, 9, 32, 4

    key = jax.random.PRNGKey(0)
    kx, k1, k2, k3, k4 = jax.random.split(key, 5)

    x = jax.random.normal(kx, (B, W, E), dtype=jnp.float32)
    params = {
        "in_proj_weight": 0.1 * jax.random.normal(k1, (3 * E, E), jnp.float32),
        "in_proj_bias":   0.1 * jax.random.normal(k2, (3 * E,), jnp.float32),
        "out_proj_weight": 0.1 * jax.random.normal(k3, (E, E), jnp.float32),
        "out_proj_bias":   0.1 * jax.random.normal(k4, (E,), jnp.float32),
    }

    ref = reference(x, params, H)

    # fp32 compute path (tolerance slightly loosened for the EUP approximate
    # reciprocal used in the softmax normalization).
    out = jax.block_until_ready(center_aligned_attention(x, params, H))
    assert out.shape == (B, E)
    assert jnp.allclose(out, ref, atol=5e-3, rtol=5e-3), "fp32 mismatch vs reference"

    # bf16 compute path (recommended on v6e/v7x: halves HBM traffic / VMEM).
    out_bf16 = jax.block_until_ready(
        center_aligned_attention(x, params, H, compute_dtype=jnp.bfloat16))
    assert jnp.allclose(out_bf16, ref, atol=5e-2, rtol=5e-2), "bf16 mismatch vs reference"

    print("KERNEL_OK")
</pallas_src>

<mosaic_0001>
module attributes {stable_mosaic.version = 11 : i64} {
  func.func @_mha_center_kernel(%arg0: i32, %arg1: memref<9x8x32xf32, #tpu.memory_space<vmem>>, %arg2: memref<32x32xf32, #tpu.memory_space<vmem>>, %arg3: memref<32x64xf32, #tpu.memory_space<vmem>>, %arg4: memref<32x32xf32, #tpu.memory_space<vmem>>, %arg5: memref<1x32xf32, #tpu.memory_space<vmem>>, %arg6: memref<1x64xf32, #tpu.memory_space<vmem>>, %arg7: memref<1x32xf32, #tpu.memory_space<vmem>>, %arg8: memref<32x4xf32, #tpu.memory_space<vmem>>, %arg9: memref<4x32xf32, #tpu.memory_space<vmem>>, %arg10: memref<8x32xf32, #tpu.memory_space<vmem>>) attributes {dimension_semantics = [#tpu.dimension_semantics<parallel>], iteration_bounds = array<i64: 1>, scalar_prefetch = 0 : i64, scratch_operands = 0 : i64, tpu.core_type = #tpu.core_type<tc>, window_params = [{transform_indices = @transform_0, window_bounds = array<i64: 9, 8, 32>}, {pipeline_mode = #tpu.pipeline_mode<synchronous>, transform_indices = @transform_1, window_bounds = array<i64: 32, 32>}, {pipeline_mode = #tpu.pipeline_mode<synchronous>, transform_indices = @transform_2, window_bounds = array<i64: 32, 64>}, {pipeline_mode = #tpu.pipeline_mode<synchronous>, transform_indices = @transform_3, window_bounds = array<i64: 32, 32>}, {pipeline_mode = #tpu.pipeline_mode<synchronous>, transform_indices = @transform_4, window_bounds = array<i64: 1, 32>}, {pipeline_mode = #tpu.pipeline_mode<synchronous>, transform_indices = @transform_5, window_bounds = array<i64: 1, 64>}, {pipeline_mode = #tpu.pipeline_mode<synchronous>, transform_indices = @transform_6, window_bounds = array<i64: 1, 32>}, {pipeline_mode = #tpu.pipeline_mode<synchronous>, transform_indices = @transform_7, window_bounds = array<i64: 32, 4>}, {pipeline_mode = #tpu.pipeline_mode<synchronous>, transform_indices = @transform_8, window_bounds = array<i64: 4, 32>}, {transform_indices = @transform_9, window_bounds = array<i64: 8, 32>}]} {
    %c0 = arith.constant 0 : index
    %c0_0 = arith.constant 0 : index
    %c0_1 = arith.constant 0 : index
    %0 = vector.load %arg1[%c0, %c0_0, %c0_1] : memref<9x8x32xf32, #tpu.memory_space<vmem>>, vector<9x8x32xf32>
    %1 = vector.shape_cast %0 : vector<9x8x32xf32> to vector<72x32xf32>
    %c0_2 = arith.constant 0 : index
    %c0_3 = arith.constant 0 : index
    %2 = vector.load %arg3[%c0_2, %c0_3] : memref<32x64xf32, #tpu.memory_space<vmem>>, vector<32x64xf32>
    %cst = arith.constant dense<0.000000e+00> : vector<72x64xf32>
    %3 = tpu.matmul %1, %2, %cst {dimension_numbers = #tpu.dot_dimension_numbers<[1], [0], [0], [1], [0, 0, 1, 1], [], []>} : vector<72x32xf32>, vector<32x64xf32>, vector<72x64xf32> -> vector<72x64xf32>
    %c0_4 = arith.constant 0 : index
    %c0_5 = arith.constant 0 : index
    %4 = vector.load %arg6[%c0_4, %c0_5] : memref<1x64xf32, #tpu.memory_space<vmem>>, vector<1x64xf32>
    %5 = vector.broadcast %4 : vector<1x64xf32> to vector<72x64xf32>
    %6 = arith.addf %3, %5 : vector<72x64xf32>
    %7 = vector.extract_strided_slice %6 {offsets = [0, 0], sizes = [72, 32], strides = [1, 1]} : vector<72x64xf32> to vector<72x32xf32>
    %8 = vector.shape_cast %7 : vector<72x32xf32> to vector<9x8x32xf32>
    %9 = vector.extract_strided_slice %6 {offsets = [0, 32], sizes = [72, 32], strides = [1, 1]} : vector<72x64xf32> to vector<72x32xf32>
    %10 = vector.shape_cast %9 : vector<72x32xf32> to vector<9x8x32xf32>
    %11 = vector.extract_strided_slice %0 {offsets = [4, 0, 0], sizes = [1, 8, 32], strides = [1, 1, 1]} : vector<9x8x32xf32> to vector<1x8x32xf32>
    %12 = vector.shape_cast %11 : vector<1x8x32xf32> to vector<8x32xf32>
    %c0_6 = arith.constant 0 : index
    %c0_7 = arith.constant 0 : index
    %13 = vector.load %arg2[%c0_6, %c0_7] : memref<32x32xf32, #tpu.memory_space<vmem>>, vector<32x32xf32>
    %cst_8 = arith.constant dense<0.000000e+00> : vector<8x32xf32>
    %14 = tpu.matmul %12, %13, %cst_8 {dimension_numbers = #tpu.dot_dimension_numbers<[1], [0], [0], [1], [0, 0, 1, 1], [], []>} : vector<8x32xf32>, vector<32x32xf32>, vector<8x32xf32> -> vector<8x32xf32>
    %c0_9 = arith.constant 0 : index
    %c0_10 = arith.constant 0 : index
    %15 = vector.load %arg5[%c0_9, %c0_10] : memref<1x32xf32, #tpu.memory_space<vmem>>, vector<1x32xf32>
    %16 = vector.broadcast %15 : vector<1x32xf32> to vector<8x32xf32>
    %17 = arith.addf %14, %16 : vector<8x32xf32>
    %18 = vector.shape_cast %17 : vector<8x32xf32> to vector<1x8x32xf32>
    %19 = vector.broadcast %18 : vector<1x8x32xf32> to vector<9x8x32xf32>
    %20 = arith.mulf %19, %8 : vector<9x8x32xf32>
    %21 = vector.shape_cast %20 : vector<9x8x32xf32> to vector<72x32xf32>
    %c0_11 = arith.constant 0 : index
    %c0_12 = arith.constant 0 : index
    %22 = vector.load %arg8[%c0_11, %c0_12] : memref<32x4xf32, #tpu.memory_space<vmem>>, vector<32x4xf32>
    %cst_13 = arith.constant dense<0.000000e+00> : vector<72x4xf32>
    %23 = tpu.matmul %21, %22, %cst_13 {dimension_numbers = #tpu.dot_dimension_numbers<[1], [0], [0], [1], [0, 0, 1, 1], [], []>} : vector<72x32xf32>, vector<32x4xf32>, vector<72x4xf32> -> vector<72x4xf32>
    %24 = vector.shape_cast %23 : vector<72x4xf32> to vector<9x8x4xf32>
    %25 = vector.extract_strided_slice %24 {offsets = [0, 0, 0], sizes = [1, 8, 4], strides = [1, 1, 1]} : vector<9x8x4xf32> to vector<1x8x4xf32>
    %26 = vector.shape_cast %25 : vector<1x8x4xf32> to vector<8x4xf32>
    %27 = vector.extract_strided_slice %24 {offsets = [1, 0, 0], sizes = [1, 8, 4], strides = [1, 1, 1]} : vector<9x8x4xf32> to vector<1x8x4xf32>
    %28 = vector.shape_cast %27 : vector<1x8x4xf32> to vector<8x4xf32>
    %29 = arith.maximumf %26, %28 : vector<8x4xf32>
    %30 = vector.extract_strided_slice %24 {offsets = [2, 0, 0], sizes = [1, 8, 4], strides = [1, 1, 1]} : vector<9x8x4xf32> to vector<1x8x4xf32>
    %31 = vector.shape_cast %30 : vector<1x8x4xf32> to vector<8x4xf32>
    %32 = arith.maximumf %29, %31 : vector<8x4xf32>
    %33 = vector.extract_strided_slice %24 {offsets = [3, 0, 0], sizes = [1, 8, 4], strides = [1, 1, 1]} : vector<9x8x4xf32> to vector<1x8x4xf32>
    %34 = vector.shape_cast %33 : vector<1x8x4xf32> to vector<8x4xf32>
    %35 = arith.maximumf %32, %34 : vector<8x4xf32>
    %36 = vector.extract_strided_slice %24 {offsets = [4, 0, 0], sizes = [1, 8, 4], strides = [1, 1, 1]} : vector<9x8x4xf32> to vector<1x8x4xf32>
    %37 = vector.shape_cast %36 : vector<1x8x4xf32> to vector<8x4xf32>
    %38 = arith.maximumf %35, %37 : vector<8x4xf32>
    %39 = vector.extract_strided_slice %24 {offsets = [5, 0, 0], sizes = [1, 8, 4], strides = [1, 1, 1]} : vector<9x8x4xf32> to vector<1x8x4xf32>
    %40 = vector.shape_cast %39 : vector<1x8x4xf32> to vector<8x4xf32>
    %41 = arith.maximumf %38, %40 : vector<8x4xf32>
    %42 = vector.extract_strided_slice %24 {offsets = [6, 0, 0], sizes = [1, 8, 4], strides = [1, 1, 1]} : vector<9x8x4xf32> to vector<1x8x4xf32>
    %43 = vector.shape_cast %42 : vector<1x8x4xf32> to vector<8x4xf32>
    %44 = arith.maximumf %41, %43 : vector<8x4xf32>
    %45 = vector.extract_strided_slice %24 {offsets = [7, 0, 0], sizes = [1, 8, 4], strides = [1, 1, 1]} : vector<9x8x4xf32> to vector<1x8x4xf32>
    %46 = vector.shape_cast %45 : vector<1x8x4xf32> to vector<8x4xf32>
    %47 = arith.maximumf %44, %46 : vector<8x4xf32>
    %48 = vector.extract_strided_slice %24 {offsets = [8, 0, 0], sizes = [1, 8, 4], strides = [1, 1, 1]} : vector<9x8x4xf32> to vector<1x8x4xf32>
    %49 = vector.shape_cast %48 : vector<1x8x4xf32> to vector<8x4xf32>
    %50 = arith.maximumf %47, %49 : vector<8x4xf32>
    %51 = vector.shape_cast %50 : vector<8x4xf32> to vector<1x8x4xf32>
    %52 = vector.broadcast %51 : vector<1x8x4xf32> to vector<9x8x4xf32>
    %53 = arith.subf %24, %52 : vector<9x8x4xf32>
    %54 = math.exp %53 : vector<9x8x4xf32>
    %55 = vector.extract_strided_slice %54 {offsets = [0, 0, 0], sizes = [1, 8, 4], strides = [1, 1, 1]} : vector<9x8x4xf32> to vector<1x8x4xf32>
    %56 = vector.shape_cast %55 : vector<1x8x4xf32> to vector<8x4xf32>
    %57 = vector.extract_strided_slice %54 {offsets = [1, 0, 0], sizes = [1, 8, 4], strides = [1, 1, 1]} : vector<9x8x4xf32> to vector<1x8x4xf32>
    %58 = vector.shape_cast %57 : vector<1x8x4xf32> to vector<8x4xf32>
    %59 = arith.addf %56, %58 : vector<8x4xf32>
    %60 = vector.extract_strided_slice %54 {offsets = [2, 0, 0], sizes = [1, 8, 4], strides = [1, 1, 1]} : vector<9x8x4xf32> to vector<1x8x4xf32>
    %61 = vector.shape_cast %60 : vector<1x8x4xf32> to vector<8x4xf32>
    %62 = arith.addf %59, %61 : vector<8x4xf32>
    %63 = vector.extract_strided_slice %54 {offsets = [3, 0, 0], sizes = [1, 8, 4], strides = [1, 1, 1]} : vector<9x8x4xf32> to vector<1x8x4xf32>
    %64 = vector.shape_cast %63 : vector<1x8x4xf32> to vector<8x4xf32>
    %65 = arith.addf %62, %64 : vector<8x4xf32>
    %66 = vector.extract_strided_slice %54 {offsets = [4, 0, 0], sizes = [1, 8, 4], strides = [1, 1, 1]} : vector<9x8x4xf32> to vector<1x8x4xf32>
    %67 = vector.shape_cast %66 : vector<1x8x4xf32> to vector<8x4xf32>
    %68 = arith.addf %65, %67 : vector<8x4xf32>
    %69 = vector.extract_strided_slice %54 {offsets = [5, 0, 0], sizes = [1, 8, 4], strides = [1, 1, 1]} : vector<9x8x4xf32> to vector<1x8x4xf32>
    %70 = vector.shape_cast %69 : vector<1x8x4xf32> to vector<8x4xf32>
    %71 = arith.addf %68, %70 : vector<8x4xf32>
    %72 = vector.extract_strided_slice %54 {offsets = [6, 0, 0], sizes = [1, 8, 4], strides = [1, 1, 1]} : vector<9x8x4xf32> to vector<1x8x4xf32>
    %73 = vector.shape_cast %72 : vector<1x8x4xf32> to vector<8x4xf32>
    %74 = arith.addf %71, %73 : vector<8x4xf32>
    %75 = vector.extract_strided_slice %54 {offsets = [7, 0, 0], sizes = [1, 8, 4], strides = [1, 1, 1]} : vector<9x8x4xf32> to vector<1x8x4xf32>
    %76 = vector.shape_cast %75 : vector<1x8x4xf32> to vector<8x4xf32>
    %77 = arith.addf %74, %76 : vector<8x4xf32>
    %78 = vector.extract_strided_slice %54 {offsets = [8, 0, 0], sizes = [1, 8, 4], strides = [1, 1, 1]} : vector<9x8x4xf32> to vector<1x8x4xf32>
    %79 = vector.shape_cast %78 : vector<1x8x4xf32> to vector<8x4xf32>
    %80 = arith.addf %77, %79 : vector<8x4xf32>
    %81 = tpu.reciprocal %80 {approx = true} : vector<8x4xf32> -> vector<8x4xf32>
    %82 = vector.shape_cast %81 : vector<8x4xf32> to vector<1x8x4xf32>
    %83 = vector.broadcast %82 : vector<1x8x4xf32> to vector<9x8x4xf32>
    %84 = arith.mulf %54, %83 : vector<9x8x4xf32>
    %85 = vector.shape_cast %84 : vector<9x8x4xf32> to vector<72x4xf32>
    %c0_14 = arith.constant 0 : index
    %c0_15 = arith.constant 0 : index
    %86 = vector.load %arg9[%c0_14, %c0_15] : memref<4x32xf32, #tpu.memory_space<vmem>>, vector<4x32xf32>
    %cst_16 = arith.constant dense<0.000000e+00> : vector<72x32xf32>
    %87 = tpu.matmul %85, %86, %cst_16 {dimension_numbers = #tpu.dot_dimension_numbers<[1], [0], [0], [1], [0, 0, 1, 1], [], []>} : vector<72x4xf32>, vector<4x32xf32>, vector<72x32xf32> -> vector<72x32xf32>
    %88 = vector.shape_cast %87 : vector<72x32xf32> to vector<9x8x32xf32>
    %89 = vector.extract_strided_slice %88 {offsets = [0, 0, 0], sizes = [1, 8, 32], strides = [1, 1, 1]} : vector<9x8x32xf32> to vector<1x8x32xf32>
    %90 = vector.shape_cast %89 : vector<1x8x32xf32> to vector<8x32xf32>
    %91 = vector.extract_strided_slice %10 {offsets = [0, 0, 0], sizes = [1, 8, 32], strides = [1, 1, 1]} : vector<9x8x32xf32> to vector<1x8x32xf32>
    %92 = vector.shape_cast %91 : vector<1x8x32xf32> to vector<8x32xf32>
    %93 = arith.mulf %90, %92 : vector<8x32xf32>
    %94 = vector.extract_strided_slice %88 {offsets = [1, 0, 0], sizes = [1, 8, 32], strides = [1, 1, 1]} : vector<9x8x32xf32> to vector<1x8x32xf32>
    %95 = vector.shape_cast %94 : vector<1x8x32xf32> to vector<8x32xf32>
    %96 = vector.extract_strided_slice %10 {offsets = [1, 0, 0], sizes = [1, 8, 32], strides = [1, 1, 1]} : vector<9x8x32xf32> to vector<1x8x32xf32>
    %97 = vector.shape_cast %96 : vector<1x8x32xf32> to vector<8x32xf32>
    %98 = arith.mulf %95, %97 : vector<8x32xf32>
    %99 = arith.addf %93, %98 : vector<8x32xf32>
    %100 = vector.extract_strided_slice %88 {offsets = [2, 0, 0], sizes = [1, 8, 32], strides = [1, 1, 1]} : vector<9x8x32xf32> to vector<1x8x32xf32>
    %101 = vector.shape_cast %100 : vector<1x8x32xf32> to vector<8x32xf32>
    %102 = vector.extract_strided_slice %10 {offsets = [2, 0, 0], sizes = [1, 8, 32], strides = [1, 1, 1]} : vector<9x8x32xf32> to vector<1x8x32xf32>
    %103 = vector.shape_cast %102 : vector<1x8x32xf32> to vector<8x32xf32>
    %104 = arith.mulf %101, %103 : vector<8x32xf32>
    %105 = arith.addf %99, %104 : vector<8x32xf32>
    %106 = vector.extract_strided_slice %88 {offsets = [3, 0, 0], sizes = [1, 8, 32], strides = [1, 1, 1]} : vector<9x8x32xf32> to vector<1x8x32xf32>
    %107 = vector.shape_cast %106 : vector<1x8x32xf32> to vector<8x32xf32>
    %108 = vector.extract_strided_slice %10 {offsets = [3, 0, 0], sizes = [1, 8, 32], strides = [1, 1, 1]} : vector<9x8x32xf32> to vector<1x8x32xf32>
    %109 = vector.shape_cast %108 : vector<1x8x32xf32> to vector<8x32xf32>
    %110 = arith.mulf %107, %109 : vector<8x32xf32>
    %111 = arith.addf %105, %110 : vector<8x32xf32>
    %112 = vector.extract_strided_slice %88 {offsets = [4, 0, 0], sizes = [1, 8, 32], strides = [1, 1, 1]} : vector<9x8x32xf32> to vector<1x8x32xf32>
    %113 = vector.shape_cast %112 : vector<1x8x32xf32> to vector<8x32xf32>
    %114 = vector.extract_strided_slice %10 {offsets = [4, 0, 0], sizes = [1, 8, 32], strides = [1, 1, 1]} : vector<9x8x32xf32> to vector<1x8x32xf32>
    %115 = vector.shape_cast %114 : vector<1x8x32xf32> to vector<8x32xf32>
    %116 = arith.mulf %113, %115 : vector<8x32xf32>
    %117 = arith.addf %111, %116 : vector<8x32xf32>
    %118 = vector.extract_strided_slice %88 {offsets = [5, 0, 0], sizes = [1, 8, 32], strides = [1, 1, 1]} : vector<9x8x32xf32> to vector<1x8x32xf32>
    %119 = vector.shape_cast %118 : vector<1x8x32xf32> to vector<8x32xf32>
    %120 = vector.extract_strided_slice %10 {offsets = [5, 0, 0], sizes = [1, 8, 32], strides = [1, 1, 1]} : vector<9x8x32xf32> to vector<1x8x32xf32>
    %121 = vector.shape_cast %120 : vector<1x8x32xf32> to vector<8x32xf32>
    %122 = arith.mulf %119, %121 : vector<8x32xf32>
    %123 = arith.addf %117, %122 : vector<8x32xf32>
    %124 = vector.extract_strided_slice %88 {offsets = [6, 0, 0], sizes = [1, 8, 32], strides = [1, 1, 1]} : vector<9x8x32xf32> to vector<1x8x32xf32>
    %125 = vector.shape_cast %124 : vector<1x8x32xf32> to vector<8x32xf32>
    %126 = vector.extract_strided_slice %10 {offsets = [6, 0, 0], sizes = [1, 8, 32], strides = [1, 1, 1]} : vector<9x8x32xf32> to vector<1x8x32xf32>
    %127 = vector.shape_cast %126 : vector<1x8x32xf32> to vector<8x32xf32>
    %128 = arith.mulf %125, %127 : vector<8x32xf32>
    %129 = arith.addf %123, %128 : vector<8x32xf32>
    %130 = vector.extract_strided_slice %88 {offsets = [7, 0, 0], sizes = [1, 8, 32], strides = [1, 1, 1]} : vector<9x8x32xf32> to vector<1x8x32xf32>
    %131 = vector.shape_cast %130 : vector<1x8x32xf32> to vector<8x32xf32>
    %132 = vector.extract_strided_slice %10 {offsets = [7, 0, 0], sizes = [1, 8, 32], strides = [1, 1, 1]} : vector<9x8x32xf32> to vector<1x8x32xf32>
    %133 = vector.shape_cast %132 : vector<1x8x32xf32> to vector<8x32xf32>
    %134 = arith.mulf %131, %133 : vector<8x32xf32>
    %135 = arith.addf %129, %134 : vector<8x32xf32>
    %136 = vector.extract_strided_slice %88 {offsets = [8, 0, 0], sizes = [1, 8, 32], strides = [1, 1, 1]} : vector<9x8x32xf32> to vector<1x8x32xf32>
    %137 = vector.shape_cast %136 : vector<1x8x32xf32> to vector<8x32xf32>
    %138 = vector.extract_strided_slice %10 {offsets = [8, 0, 0], sizes = [1, 8, 32], strides = [1, 1, 1]} : vector<9x8x32xf32> to vector<1x8x32xf32>
    %139 = vector.shape_cast %138 : vector<1x8x32xf32> to vector<8x32xf32>
    %140 = arith.mulf %137, %139 : vector<8x32xf32>
    %141 = arith.addf %135, %140 : vector<8x32xf32>
    %c0_17 = arith.constant 0 : index
    %c0_18 = arith.constant 0 : index
    %142 = vector.load %arg4[%c0_17, %c0_18] : memref<32x32xf32, #tpu.memory_space<vmem>>, vector<32x32xf32>
    %cst_19 = arith.constant dense<0.000000e+00> : vector<8x32xf32>
    %143 = tpu.matmul %141, %142, %cst_19 {dimension_numbers = #tpu.dot_dimension_numbers<[1], [0], [0], [1], [0, 0, 1, 1], [], []>} : vector<8x32xf32>, vector<32x32xf32>, vector<8x32xf32> -> vector<8x32xf32>
    %c0_20 = arith.constant 0 : index
    %c0_21 = arith.constant 0 : index
    %144 = vector.load %arg7[%c0_20, %c0_21] : memref<1x32xf32, #tpu.memory_space<vmem>>, vector<1x32xf32>
    %145 = vector.broadcast %144 : vector<1x32xf32> to vector<8x32xf32>
    %146 = arith.addf %143, %145 : vector<8x32xf32>
    %c0_22 = arith.constant 0 : index
    %c0_23 = arith.constant 0 : index
    %147 = vector.load %arg10[%c0_22, %c0_23] : memref<8x32xf32, #tpu.memory_space<vmem>>, vector<8x32xf32>
    tpu.vector_store %arg10[%c0_22, %c0_23], %146 {strides = array<i32>} : memref<8x32xf32, #tpu.memory_space<vmem>>, vector<8x32xf32>,
    return
  }
  func.func @transform_0(%arg0: i32) -> (i32, i32, i32) {
    %c0_i32 = arith.constant 0 : i32
    %c0_i32_0 = arith.constant 0 : i32
    %c0_i32_1 = arith.constant 0 : i32
    return %c0_i32, %arg0, %c0_i32_0 : i32, i32, i32
  }
  func.func @transform_1(%arg0: i32) -> (i32, i32) {
    %c0_i32 = arith.constant 0 : i32
    %c0_i32_0 = arith.constant 0 : i32
    %c0_i32_1 = arith.constant 0 : i32
    return %c0_i32, %c0_i32_0 : i32, i32
  }
  func.func @transform_2(%arg0: i32) -> (i32, i32) {
    %c0_i32 = arith.constant 0 : i32
    %c0_i32_0 = arith.constant 0 : i32
    %c0_i32_1 = arith.constant 0 : i32
    return %c0_i32, %c0_i32_0 : i32, i32
  }
  func.func @transform_3(%arg0: i32) -> (i32, i32) {
    %c0_i32 = arith.constant 0 : i32
    %c0_i32_0 = arith.constant 0 : i32
    %c0_i32_1 = arith.constant 0 : i32
    return %c0_i32, %c0_i32_0 : i32, i32
  }
  func.func @transform_4(%arg0: i32) -> (i32, i32) {
    %c0_i32 = arith.constant 0 : i32
    %c0_i32_0 = arith.constant 0 : i32
    %c0_i32_1 = arith.constant 0 : i32
    return %c0_i32, %c0_i32_0 : i32, i32
  }
  func.func @transform_5(%arg0: i32) -> (i32, i32) {
    %c0_i32 = arith.constant 0 : i32
    %c0_i32_0 = arith.constant 0 : i32
    %c0_i32_1 = arith.constant 0 : i32
    return %c0_i32, %c0_i32_0 : i32, i32
  }
  func.func @transform_6(%arg0: i32) -> (i32, i32) {
    %c0_i32 = arith.constant 0 : i32
    %c0_i32_0 = arith.constant 0 : i32
    %c0_i32_1 = arith.constant 0 : i32
    return %c0_i32, %c0_i32_0 : i32, i32
  }
  func.func @transform_7(%arg0: i32) -> (i32, i32) {
    %c0_i32 = arith.constant 0 : i32
    %c0_i32_0 = arith.constant 0 : i32
    %c0_i32_1 = arith.constant 0 : i32
    return %c0_i32, %c0_i32_0 : i32, i32
  }
  func.func @transform_8(%arg0: i32) -> (i32, i32) {
    %c0_i32 = arith.constant 0 : i32
    %c0_i32_0 = arith.constant 0 : i32
    %c0_i32_1 = arith.constant 0 : i32
    return %c0_i32, %c0_i32_0 : i32, i32
  }
  func.func @transform_9(%arg0: i32) -> (i32, i32) {
    %c0_i32 = arith.constant 0 : i32
    %c0_i32_0 = arith.constant 0 : i32
    return %arg0, %c0_i32 : i32, i32
  }
}

</mosaic_0001>

<bundles_post_ra>
// kernel: tpu_custom_call.1
= control target key start
LH: loop header
LB: loop body
LE: loop exit
PB: predicated region body
PF: predicated region fallthrough
CT: control target
= control target key end

     0   :  { %14 = vsyncpa [#allocation3], 0  ;;  %s1433_s0 = inlined_call_operand.hbm [shape: f32[9,8,32], index: 0, kind: input, shape index: {}]   ;;  %s1434_s1 = inlined_call_operand.vmem [shape: f32[32,32], index: 1, kind: input, shape index: {}]   ;;  %s1435_s2 = inlined_call_operand.hbm [shape: f32[32,64], index: 2, kind: input, shape index: {}]   ;;  %s1436_s3 = inlined_call_operand.hbm [shape: f32[32,32], index: 3, kind: input, shape index: {}]   ;;  %s1437_s4 = inlined_call_operand.vmem [shape: f32[1,32], index: 4, kind: input, shape index: {}]   ;;  %s1438_s5 = inlined_call_operand.vmem [shape: f32[1,64], index: 5, kind: input, shape index: {}]   ;;  %s1439_s6 = inlined_call_operand.vmem [shape: f32[1,32], index: 6, kind: input, shape index: {}]   ;;  %s1440_s7 = inlined_call_operand.vmem [shape: f32[32,4], index: 7, kind: input, shape index: {}]   ;;  %s1441_s8 = inlined_call_operand.vmem [shape: f32[4,32], index: 8, kind: input, shape index: {}]   ;;  %s1442_s9 = inlined_call_operand.hbm [shape: f32[8,32], index: 9, kind: output, shape index: {}]  }
   0x1   :  { %15 = vsyncpa [#allocation6], 0 }
   0x2   :  { %16 = vsyncpa [#allocation4], 0  ;;  %s1165_s30 = smov [#allocation5]   ;;  %s1166_s11 = smov [#allocation2]  }
   0x3   :  { %s36_s10 = sshll.u32 %s1165_s30, 4  ;;  %s22_s12 = sshll.u32 %s1166_s11, 4  ;;  %s37_s10 = int_to_ptr.vmem [resolvable:$true] %s36_s10  ;;  %s1225_s12 = int_to_ptr.vmem [resolvable:$true] %s22_s12 }
   0x4   :  { %s1071_s15 = scalar_lea.hbm %s1435_s2, 512 }
   0x5   :  { %p1072_p0 = scmp.ne.s32.totalorder %s1435_s2, %s1071_s15  ;;  %p1075_p1 = scmp.lt.u32.totalorder %s1071_s15, %s1435_s2 }
   0x7   :  { %p1077_p2 = pnand %p1075_p1, %p1072_p0 }
   0x9   :  { %1080 = shalt.err (!%p1077_p2)
}
   0xa   :  { %s1081_s20 = scalar_lea.vmem %s37_s10, 512  ;;  %p1086_p4 = scmp.lt.s32.totalorder %s37_s10, %s37_s10 }
   0xb   :  { %p1082_p3 = scmp.ne.s32.totalorder %s37_s10, %s1081_s20  ;;  %p1087_p5 = scmp.lt.s32.totalorder %s1081_s20, %s1081_s20 }
   0xd   :  { %p1088_p6 = por %p1087_p5, %p1086_p4 }
   0xf   :  { %p1089_p7 = pnand %p1088_p6, %p1082_p3 }
  0x11   :  { %1092 = shalt.err (!%p1089_p7)
}
  0x12   :  { %s1167_s21 = smov 128   ;;  %s1168_s22 = smov 8  }
  0x13   :  { %42 = dma.hbm_to_vmem [thread:$0]  %s1435_s2, 512, %s37_s10, [#allocation6], %s1167_s21, %s1167_s21, %s1168_s22  }
  0x14   :  { %s1093_s27 = scalar_lea.hbm %s1433_s0, 1152 }
  0x15   :  { %p1094_p8 = scmp.ne.s32.totalorder %s1433_s0, %s1093_s27  ;;  %p1097_p9 = scmp.lt.u32.totalorder %s1093_s27, %s1433_s0 }
  0x17   :  { %p1099_p10 = pnand %p1097_p9, %p1094_p8 }
  0x19   :  { %1102 = shalt.err (!%p1099_p10)
}
  0x1a   :  { %s1103_s13 = scalar_lea.vmem %s1225_s12, 1152  ;;  %p1108_p12 = scmp.lt.s32.totalorder %s1225_s12, %s1225_s12 }
  0x1b   :  { %p1104_p11 = scmp.ne.s32.totalorder %s1225_s12, %s1103_s13  ;;  %p1109_p13 = scmp.lt.s32.totalorder %s1103_s13, %s1103_s13 }
  0x1d   :  { %p1110_p0 = por %p1109_p13, %p1108_p12 }
  0x1f   :  { %p1111_p1 = pnand %p1110_p0, %p1104_p11 }
  0x21   :  { %1114 = shalt.err (!%p1111_p1)
}
  0x22   :  { %28 = dma.hbm_to_vmem [thread:$0]  %s1433_s0, 1152, %s1225_s12, [#allocation3], %s1167_s21, %s1167_s21, %s1168_s22  }
  0x23   :  { %s1169_s14 = smov [#allocation7]   ;;  %s1115_s18 = scalar_lea.hbm %s1436_s3, 512 }
  0x24   :  { %s48_s15 = sshll.u32 %s1169_s14, 4  ;;  %p1116_p2 = scmp.ne.s32.totalorder %s1436_s3, %s1115_s18  ;;  %s49_s15 = int_to_ptr.vmem [resolvable:$true] %s48_s15 }
  0x25   :  { %p1119_p3 = scmp.lt.u32.totalorder %s1115_s18, %s1436_s3 }
  0x27   :  { %p1121_p4 = pnand %p1119_p3, %p1116_p2 }
  0x29   :  { %1124 = shalt.err (!%p1121_p4)
}
  0x2a   :  { %s1125_s25 = scalar_lea.vmem %s49_s15, 512  ;;  %p1130_p6 = scmp.lt.s32.totalorder %s49_s15, %s49_s15 }
  0x2b   :  { %p1126_p5 = scmp.ne.s32.totalorder %s49_s15, %s1125_s25  ;;  %p1131_p7 = scmp.lt.s32.totalorder %s1125_s25, %s1125_s25 }
  0x2d   :  { %p1132_p8 = por %p1131_p7, %p1130_p6 }
  0x2f   :  { %p1133_p9 = pnand %p1132_p8, %p1126_p5 }
  0x31   :  { %1136 = shalt.err (!%p1133_p9)
}
  0x32   :  { %54 = dma.hbm_to_vmem [thread:$0]  %s1436_s3, 512, %s49_s15, [#allocation6], %s1167_s21, %s1167_s21, %s1168_s22  }
  0x33   :  { %1159 = dma.done.wait [#allocation3], 1152  }
  0x34   :  { %1160 = vsyncadd [#allocation3], 4294966144 }
  0x35   :  { %1161 = dma.done.wait [#allocation6], 1024  }
  0x36   :  { %1162 = vsyncadd [#allocation6], 4294966272  ;;  %v1170_v0 = vmov 0.0|0.0   ;;  %vm1171_vm0 = vmmov 0   ;;  %v1172_v1 = vmov 0.0   ;;  %v83_v2 = vld [vmem:[#allocation5] sm:$0xff] }
  0x37   :  { %1013 = vmatprep.subr.bf16.mxu0 %v1170_v0  ;;  %1037 = vmatprep.subr.bf16.mxu1 %v1170_v0  ;;  %v84_v3 = vld [vmem:[#allocation5 + $0x8] sm:$0xff]  ;;  %v85_v4 = vld [vmem:[#allocation5 + $0x10] sm:$0xff]  ;;  %v86_v6 = vld [vmem:[#allocation5 + $0x18] sm:$0xff]  ;;  %vm94_vm1 = vcmask 261120   ;;  %s1173_s19 = smov 96   ;;  %vm545_vm2 = vcmask 1043456  }
  0x38   :  { %900 = vmatprep.mubr.msk.f32.mxu0 %vm1171_vm0, %v1172_v1  ;;  %918 = vmatprep.mubr.msk.f32.mxu1 %vm1171_vm0, %v1172_v1  ;;  %v1014_v5 = vpack.c.bf16 %v84_v3, %v83_v2  ;;  %v1017_v7 = vpack.c.bf16 %v86_v6, %v85_v4  ;;  %v232_v8 = vld [vmem:[%s1434_s1] sm:$0xff]  ;;  %v233_v9 = vld [vmem:[%s1434_s1 + $0x8] sm:$0xff]  ;;  %v80_v11 = vld [vmem:[#allocation2 + $0x30] sm:$0xff]  ;;  %vm517_vm3 = vcmask 31744   ;;  %s1174_s24 = smov [#allocation8]  }
  0x39   :  { %v74_v10 = vld [vmem:[#allocation2] sm:$0xff]  ;;  %v1020_v12 = vpack.c.bf16 %v233_v9, %v232_v8  ;;  %v234_v13 = vld [vmem:[%s1434_s1 + $0x10] sm:$0xff]  ;;  %v235_v14 = vld [vmem:[%s1434_s1 + $0x18] sm:$0xff]  ;;  %s803_s25 = sshll.u32 %s1174_s24, 4  ;;  %s804_s25 = int_to_ptr.vmem [resolvable:$true] %s803_s25 }
  0x3a   :  { %1015 = vmatpush3.bf16.msra.mxu0 %v1014_v5  ;;  %1039 = vmatpush3.bf16.msra.mxu1 %v1014_v5  ;;  %v75_v15 = vld [vmem:[#allocation2 + $0x8] sm:$0xff]  ;;  %v81_v16 = vld [vmem:[#allocation2 + $0x38] sm:$0xff]  ;;  %v1023_v17 = vpack.c.bf16 %v235_v14, %v234_v13  ;;  %v76_v18 = vld [vmem:[#allocation2 + $0x10] sm:$0xff]  ;;  %s1137_s0 = scalar_lea.vmem %s804_s25, 128  ;;  %p1142_p11 = scmp.lt.s32.totalorder %s804_s25, %s804_s25 }
  0x3b   :  { %1016 = vmatprep.subr.bf16.mxu0 %v1170_v0  ;;  %1038 = vmatprep.subr.bf16.mxu1 %v1170_v0  ;;  %v82_v19 = vld [vmem:[#allocation2 + $0x40] sm:$0xff]  ;;  %v77_v20 = vld [vmem:[#allocation2 + $0x18] sm:$0xff]  ;;  %v79_v22 = vld [vmem:[#allocation2 + $0x28] sm:$0xff]  ;;  %p1138_p10 = scmp.ne.s32.totalorder %s804_s25, %s1137_s0  ;;  %p1143_p12 = scmp.lt.s32.totalorder %s1137_s0, %s1137_s0 }
  0x3c   :  { %v78_v21 = vld [vmem:[#allocation2 + $0x20] sm:$0xff]  ;;  %v323_v24 = vld [vmem:[%s1440_s7 + $0x8] sm:$0xff]  ;;  %v324_v26 = vld [vmem:[%s1440_s7 + $0x10] sm:$0xff] }
  0x3d   :  { %v322_v23 = vld [vmem:[%s1440_s7] sm:$0xff]  ;;  %v325_v27 = vld [vmem:[%s1440_s7 + $0x18] sm:$0xff]  ;;  %p1144_p13 = por %p1143_p12, %p1142_p11 }
  0x3e   :  { %1018 = vmatpush3.bf16.msra.mxu0 %v1017_v7  ;;  %1040 = vmatpush3.bf16.msra.mxu1 %v1017_v7  ;;  %v1026_v25 = vpack.c.bf16 %v323_v24, %v322_v23  ;;  %v1029_v28 = vpack.c.bf16 %v325_v27, %v324_v26  ;;  %v813_v29 = vld [vmem:[%s1438_s5] ss:$0 sm:$0xff] }
  0x3f   :  { %1019 = vmatprep.subr.bf16.mxu1 %v1170_v0  ;;  %973 = vmatprep.subr.mxu0 %v1172_v1  ;;  %v823_v45 = vld [vmem:[%s1437_s4] ss:$0 sm:$0xff]  ;;  %p1145_p0 = pnand %p1144_p13, %p1138_p10 }
  0x40   :  { %v516_v8 = vld [vmem:[%s1441_s8] sm:$0xf] }
  0x41   :  { %901 = vmatmul.mubr.msk.f32.vlgmr.msra.gmra.mrb[0].mxu0 %vm94_vm1, %v74_v10  ;;  %919 = vmatmul.mubr.msk.f32.vlgmr.msra.gmra.mrb[0].mxu1 %vm94_vm1, %v80_v11 }
  0x42   :  { %1021 = vmatpush3.bf16.msra.mxu1 %v1020_v12  ;;  %903 = vmatprep.mubr.msk.f32.mxu0 %vm1171_vm0, %v1172_v1 }
  0x43   :  { %921 = vmatprep.mubr.msk.f32.mxu1 %vm1171_vm0, %v1172_v1  ;;  %1022 = vmatprep.subr.bf16.mxu1 %v1170_v0 }
  0x44   :  { %974 = vmatpush3.msk.msra.mxu0 %vm545_vm2, %v516_v8 }
  0x45   :  { %904 = vmatmul.mubr.msk.f32.gmra.mrb[2].mxu0 %vm94_vm1, %v75_v15  ;;  %922 = vmatmul.mubr.msk.f32.gmra.mrb[2].mxu1 %vm94_vm1, %v81_v16 }
  0x46   :  { %906 = vmatprep.mubr.msk.f32.mxu0 %vm1171_vm0, %v1172_v1  ;;  %924 = vmatprep.mubr.msk.f32.mxu1 %vm1171_vm0, %v1172_v1 }
  0x47   :  { %1024 = vmatpush3.bf16.msra.mxu1 %v1023_v17 }
  0x48   :  { %1025 = vmatprep.subr.bf16.mxu1 %v1170_v0 }
  0x49   :  { %907 = vmatmul.mubr.msk.f32.gmra.mrb[4].mxu0 %vm94_vm1, %v76_v18  ;;  %925 = vmatmul.mubr.msk.f32.gmra.mrb[4].mxu1 %vm94_vm1, %v82_v19 }
  0x4a   :  { %909 = vmatprep.mubr.msk.f32.mxu0 %vm1171_vm0, %v1172_v1  ;;  %935 = vmatprep.mubr.msk.f32.mxu1 %vm1171_vm0, %v1172_v1 }
  0x4d   :  { %910 = vmatmul.mubr.msk.f32.gmra.mrb[6].mxu0 %vm94_vm1, %v77_v20  ;;  %936 = vmatmul.mubr.msk.f32.vlgmr.msra.gmra.mrb[6].mxu1 %vm94_vm1, %v78_v21 }
  0x4e   :  { %912 = vmatprep.mubr.msk.f32.mxu0 %vm1171_vm0, %v1172_v1  ;;  %946 = vmatprep.mubr.msk.f32.mxu1 %vm1171_vm0, %v1172_v1 }
  0x4f   :  { %1027 = vmatpush3.bf16.msra.mxu1 %v1026_v25 }
  0x50   :  { %1028 = vmatprep.subr.bf16.mxu1 %v1170_v0 }
  0x51   :  { %913 = vmatmul.mubr.msk.f32.gmra.mrb[8].mxu0 %vm94_vm1, %v78_v21 }
  0x52   :  { %915 = vmatprep.mubr.msk.f32.mxu0 %vm1171_vm0, %v1172_v1 }
  0x53   :  { %1030 = vmatpush3.bf16.msra.mxu1 %v1029_v28 }
  0x54   :  { %1031 = vmatprep.subr.bf16.mxu1 %v1170_v0 }
  0x55   :  { %916 = vmatmul.mubr.msk.f32.gmra.mrb[10].mxu0 %vm94_vm1, %v79_v22 }
  0x56   :  { %975 = vmatprep.mubr.msk.f32.mxu0 %vm1171_vm0, %v1172_v1 }
 0x114   :  { %v218_v30 = vpop.f32.mrb[0].mxu1  ;;  %v188_v31 = vpop.f32.mrb[0].mxu0 }
 0x115   :  { %v920_v32 = vpop.f32.mrb[1].mxu1  ;;  %v189_v33 = vadd.f32 %v813_v29, %v188_v31  ;;  %v902_v34 = vpop.f32.mrb[1].mxu0  ;;  %v219_v52 = vadd.f32 %v813_v29, %v218_v30 }
 0x117   :  { %660 = vrot.lane.b32.xlu0 %v189_v33, %s1173_s19 }
 0x118   :  { %v223_v35 = vpop.f32.mrb[2].mxu1  ;;  %v193_v36 = vpop.f32.mrb[2].mxu0 }
 0x119   :  { %v923_v37 = vpop.f32.mrb[3].mxu1  ;;  %v194_v38 = vadd.f32 %v813_v29, %v193_v36  ;;  %v905_v39 = vpop.f32.mrb[3].mxu0  ;;  %v224_v53 = vadd.f32 %v813_v29, %v223_v35 }
 0x11b   :  { %665 = vrot.lane.b32.xlu0 %v194_v38, %s1173_s19 }
 0x11c   :  { %v228_v40 = vpop.f32.mrb[4].mxu1  ;;  %v198_v41 = vpop.f32.mrb[4].mxu0 }
 0x11d   :  { %v926_v42 = vpop.f32.mrb[5].mxu1  ;;  %v199_v43 = vadd.f32 %v813_v29, %v198_v41  ;;  %v908_v44 = vpop.f32.mrb[5].mxu0  ;;  %v229_v54 = vadd.f32 %v813_v29, %v228_v40 }
 0x11f   :  { %671 = vrot.lane.b32.xlu1 %v199_v43, %s1173_s19 }
 0x120   :  { %v309_v46 = vpop.f32.mrb[6].mxu1  ;;  %v203_v47 = vpop.f32.mrb[6].mxu0 }
 0x121   :  { %v310_v48 = vadd.f32 %v823_v45, %v309_v46  ;;  %v204_v49 = vadd.f32 %v813_v29, %v203_v47  ;;  %v937_v50 = vpop.f32.mrb[7].mxu1  ;;  %v911_v51 = vpop.f32.mrb[7].mxu0 }
 0x123   :  { %v316_v55 = vmul.f32 %v310_v48, %v204_v49  ;;  %v313_v56 = vmul.f32 %v310_v48, %v189_v33  ;;  %677 = vrot.lane.b32.xlu1 %v204_v49, %s1173_s19  ;;  %v314_v57 = vmul.f32 %v310_v48, %v194_v38  ;;  %v315_v58 = vmul.f32 %v310_v48, %v199_v43 }
 0x124   :  { %v208_v59 = vpop.f32.mrb[8].mxu0  ;;  %v319_v60 = vmul.f32 %v310_v48, %v219_v52  ;;  %v320_v61 = vmul.f32 %v310_v48, %v224_v53  ;;  %v321_v62 = vmul.f32 %v310_v48, %v229_v54 }
 0x125   :  { %v209_v63 = vadd.f32 %v813_v29, %v208_v59  ;;  %947 = vmatmul.mubr.msk.f32.vlgmr.msra.gmra.mrb[8].mxu1 %vm94_vm1, %v313_v56  ;;  %v914_v2 = vpop.f32.mrb[9].mxu0 }
 0x126   :  { %949 = vmatprep.mubr.msk.f32.mxu1 %vm1171_vm0, %v1172_v1 }
 0x127   :  { %v317_v3 = vmul.f32 %v310_v48, %v209_v63  ;;  %683 = vrot.lane.b32.xlu0 %v209_v63, %s1173_s19 }
 0x128   :  { %v213_v4 = vpop.f32.mrb[10].mxu0 }
 0x129   :  { %v214_v5 = vadd.f32 %v813_v29, %v213_v4  ;;  %950 = vmatmul.mubr.msk.f32.gmra.mrb[10].mxu1 %vm94_vm1, %v314_v57  ;;  %v917_v6 = vpop.f32.mrb[11].mxu0 }
 0x12a   :  { %952 = vmatprep.mubr.msk.f32.mxu1 %vm1171_vm0, %v1172_v1 }
 0x12b   :  { %v318_v7 = vmul.f32 %v310_v48, %v214_v5  ;;  %695 = vrot.lane.b32.xlu0 %v219_v52, %s1173_s19  ;;  %689 = vrot.lane.b32.xlu1 %v214_v5, %s1173_s19 }
 0x12d   :  { %953 = vmatmul.mubr.msk.f32.gmra.mrb[12].mxu1 %vm94_vm1, %v315_v58 }
 0x12e   :  { %955 = vmatprep.mubr.msk.f32.mxu1 %vm1171_vm0, %v1172_v1 }
 0x12f   :  { %707 = vrot.lane.b32.xlu0 %v229_v54, %s1173_s19  ;;  %701 = vrot.lane.b32.xlu1 %v224_v53, %s1173_s19 }
 0x131   :  { %956 = vmatmul.mubr.msk.f32.gmra.mrb[14].mxu1 %vm94_vm1, %v316_v55 }
 0x132   :  { %958 = vmatprep.mubr.msk.f32.mxu1 %vm1171_vm0, %v1172_v1 }
 0x135   :  { %959 = vmatmul.mubr.msk.f32.gmra.mrb[16].mxu1 %vm94_vm1, %v317_v3 }
 0x136   :  { %961 = vmatprep.mubr.msk.f32.mxu1 %vm1171_vm0, %v1172_v1 }
 0x139   :  { %962 = vmatmul.mubr.msk.f32.gmra.mrb[18].mxu1 %vm94_vm1, %v318_v7 }
 0x13a   :  { %964 = vmatprep.mubr.msk.f32.mxu1 %vm1171_vm0, %v1172_v1 }
 0x13d   :  { %965 = vmatmul.mubr.msk.f32.gmra.mrb[20].mxu1 %vm94_vm1, %v319_v60 }
 0x13e   :  { %967 = vmatprep.mubr.msk.f32.mxu1 %vm1171_vm0, %v1172_v1 }
 0x141   :  { %968 = vmatmul.mubr.msk.f32.gmra.mrb[22].mxu1 %vm94_vm1, %v320_v61 }
 0x142   :  { %970 = vmatprep.mubr.msk.f32.mxu1 %vm1171_vm0, %v1172_v1 }
 0x145   :  { %971 = vmatmul.mubr.msk.f32.gmra.mrb[24].mxu1 %vm94_vm1, %v321_v62 }
 0x146   :  { %1010 = vmatprep.mubr.msk.f32.mxu1 %vm1171_vm0, %v1172_v1 }
 0x1f8   :  { %v419_v9 = vpop.f32.mrb[8].mxu1 }
 0x1f9   :  { %v948_v10 = vpop.f32.mrb[9].mxu1 }
 0x1fc   :  { %v424_v11 = vpop.f32.mrb[10].mxu1 }
 0x1fd   :  { %v463_v12 = vmax.f32 %v419_v9, %v424_v11  ;;  %v951_v13 = vpop.f32.mrb[11].mxu1 }
 0x200   :  { %v429_v14 = vpop.f32.mrb[12].mxu1 }
 0x201   :  { %v464_v15 = vmax.f32 %v463_v12, %v429_v14  ;;  %v954_v16 = vpop.f32.mrb[13].mxu1 }
 0x204   :  { %v434_v17 = vpop.f32.mrb[14].mxu1 }
 0x205   :  { %v465_v18 = vmax.f32 %v464_v15, %v434_v17  ;;  %v957_v19 = vpop.f32.mrb[15].mxu1 }
 0x206   :  { %v713_v19 = vld [vmem:[#allocation7 + $0x8] sm:$0xff] }
 0x208   :  { %v439_v20 = vpop.f32.mrb[16].mxu1 }
 0x209   :  { %v466_v21 = vmax.f32 %v465_v18, %v439_v20  ;;  %v960_v22 = vpop.f32.mrb[17].mxu1  ;;  %v712_v18 = vld [vmem:[#allocation7] sm:$0xff] }
 0x20a   :  { %v715_v22 = vld [vmem:[#allocation7 + $0x18] sm:$0xff] }
 0x20c   :  { %v444_v23 = vpop.f32.mrb[18].mxu1 }
 0x20d   :  { %v467_v24 = vmax.f32 %v466_v21, %v444_v23  ;;  %v963_v25 = vpop.f32.mrb[19].mxu1  ;;  %v714_v21 = vld [vmem:[#allocation7 + $0x10] sm:$0xff] }
 0x210   :  { %v449_v26 = vpop.f32.mrb[20].mxu1 }
 0x211   :  { %v468_v27 = vmax.f32 %v467_v24, %v449_v26  ;;  %v966_v28 = vpop.f32.mrb[21].mxu1  ;;  %v661_v24 = vpop.permute.xlu0 %660 }
 0x214   :  { %v454_v29 = vpop.f32.mrb[22].mxu1 }
 0x215   :  { %v469_v30 = vmax.f32 %v468_v27, %v454_v29  ;;  %v969_v31 = vpop.f32.mrb[23].mxu1  ;;  %v666_v27 = vpop.permute.xlu0 %665 }
 0x216   :  { %v672_v31 = vpop.permute.xlu1 %671 }
 0x218   :  { %v459_v32 = vpop.f32.mrb[24].mxu1 }
 0x219   :  { %v470_v33 = vmax.f32 %v469_v30, %v459_v32  ;;  %v972_v34 = vpop.f32.mrb[25].mxu1 }
 0x21b   :  { %v471_v35 = vsub.f32 %v419_v9, %v470_v33  ;;  %v472_v36 = vsub.f32 %v424_v11, %v470_v33  ;;  %v473_v37 = vsub.f32 %v429_v14, %v470_v33  ;;  %v474_v38 = vsub.f32 %v434_v17, %v470_v33 }
 0x21c   :  { %v475_v39 = vsub.f32 %v439_v20, %v470_v33  ;;  %v476_v40 = vsub.f32 %v444_v23, %v470_v33  ;;  %v477_v41 = vsub.f32 %v449_v26, %v470_v33  ;;  %v478_v42 = vsub.f32 %v454_v29, %v470_v33 }
 0x21d   :  { %v479_v43 = vsub.f32 %v459_v32, %v470_v33  ;;  %v480_v44 = vmul.f32 1.442695, %v471_v35  ;;  %v482_v45 = vmul.f32 1.442695, %v472_v36  ;;  %v484_v46 = vmul.f32 1.442695, %v473_v37  ;;  %v678_v37 = vpop.permute.xlu1 %677 }
 0x21e   :  { %v486_v47 = vmul.f32 1.442695, %v474_v38  ;;  %v488_v48 = vmul.f32 1.442695, %v475_v39  ;;  %v490_v49 = vmul.f32 1.442695, %v476_v40  ;;  %v1032_v20 = vpack.c.bf16 %v713_v19, %v712_v18 }
 0x21f   :  { %1051 = vpow2.f32 %v480_v44  ;;  %v492_v50 = vmul.f32 1.442695, %v477_v41  ;;  %v494_v51 = vmul.f32 1.442695, %v478_v42  ;;  %v496_v54 = vmul.f32 1.442695, %v479_v43  ;;  %v684_v41 = vpop.permute.xlu0 %683 }
 0x220   :  { %1053 = vpow2.f32 %v482_v45  ;;  %1033 = vmatpush3.bf16.msra.mxu1 %v1032_v20  ;;  %v1035_v23 = vpack.c.bf16 %v715_v22, %v714_v21 }
 0x221   :  { %1055 = vpow2.f32 %v484_v46  ;;  %1034 = vmatprep.subr.bf16.mxu1 %v1170_v0  ;;  %v690_v46 = vpop.permute.xlu1 %689 }
 0x222   :  { %1057 = vpow2.f32 %v486_v47 }
 0x223   :  { %1059 = vpow2.f32 %v488_v48 }
 0x224   :  { %1061 = vpow2.f32 %v490_v49  ;;  %1036 = vmatpush3.bf16.msra.mxu1 %v1035_v23 }
 0x225   :  { %1063 = vpow2.f32 %v492_v50 }
 0x226   :  { %1065 = vpow2.f32 %v494_v51  ;;  %v696_v51 = vpop.permute.xlu0 %695 }
 0x227   :  { %1067 = vpow2.f32 %v496_v54 }
 0x229   :  { %v1052_v52 = vpop.eup %1051 }
 0x22a   :  { %v1054_v53 = vpop.eup %1053 }
 0x22b   :  { %v498_v55 = vadd.f32 %v1054_v53, %v1052_v52  ;;  %v1056_v56 = vpop.eup %1055 }
 0x22c   :  { %v1058_v58 = vpop.eup %1057 }
 0x22d   :  { %v499_v57 = vadd.f32 %v1056_v56, %v498_v55  ;;  %v1060_v60 = vpop.eup %1059 }
 0x22e   :  { %v1062_v62 = vpop.eup %1061 }
 0x22f   :  { %v500_v59 = vadd.f32 %v1058_v58, %v499_v57  ;;  %v1064_v2 = vpop.eup %1063 }
 0x230   :  { %v1066_v4 = vpop.eup %1065 }
 0x231   :  { %v501_v61 = vadd.f32 %v1060_v60, %v500_v59  ;;  %v1068_v6 = vpop.eup %1067 }
 0x233   :  { %v502_v63 = vadd.f32 %v1062_v62, %v501_v61  ;;  %v708_v61 = vpop.permute.xlu0 %707 }
 0x235   :  { %v503_v3 = vadd.f32 %v1064_v2, %v502_v63 }
 0x237   :  { %v504_v5 = vadd.f32 %v1066_v4, %v503_v3 }
 0x239   :  { %v505_v7 = vadd.f32 %v1068_v6, %v504_v5 }
 0x23b   :  { %1069 = vrcp.f32 %v505_v7 }
 0x245   :  { %v1070_v8 = vpop.eup %1069 }
 0x246   :  { %v507_v9 = vmul.f32 %v1070_v8, %v1052_v52  ;;  %v508_v10 = vmul.f32 %v1070_v8, %v1054_v53  ;;  %v509_v11 = vmul.f32 %v1070_v8, %v1056_v56  ;;  %v510_v12 = vmul.f32 %v1070_v8, %v1058_v58  ;;  %v702_v56 = vpop.permute.xlu1 %701 }
 0x247   :  { %v511_v13 = vmul.f32 %v1070_v8, %v1060_v60  ;;  %v512_v14 = vmul.f32 %v1070_v8, %v1062_v62  ;;  %v513_v15 = vmul.f32 %v1070_v8, %v1064_v2  ;;  %v514_v16 = vmul.f32 %v1070_v8, %v1066_v4  ;;  %v844_v4 = vld [vmem:[%s1439_s6] ss:$0 sm:$0xff] }
 0x248   :  { %976 = vmatmul.mubr.msk.f32.vlgmr.msra.gmra.mrb[12].mxu0 %vm517_vm3, %v507_v9  ;;  %v515_v17 = vmul.f32 %v1070_v8, %v1068_v6 }
 0x249   :  { %978 = vmatprep.mubr.msk.f32.mxu0 %vm1171_vm0, %v1172_v1 }
 0x24c   :  { %979 = vmatmul.mubr.msk.f32.gmra.mrb[14].mxu0 %vm517_vm3, %v508_v10 }
 0x24d   :  { %981 = vmatprep.mubr.msk.f32.mxu0 %vm1171_vm0, %v1172_v1 }
 0x250   :  { %982 = vmatmul.mubr.msk.f32.gmra.mrb[16].mxu0 %vm517_vm3, %v509_v11 }
 0x251   :  { %984 = vmatprep.mubr.msk.f32.mxu0 %vm1171_vm0, %v1172_v1 }
 0x254   :  { %985 = vmatmul.mubr.msk.f32.gmra.mrb[18].mxu0 %vm517_vm3, %v510_v12 }
 0x255   :  { %987 = vmatprep.mubr.msk.f32.mxu0 %vm1171_vm0, %v1172_v1 }
 0x258   :  { %988 = vmatmul.mubr.msk.f32.gmra.mrb[20].mxu0 %vm517_vm3, %v511_v13 }
 0x259   :  { %990 = vmatprep.mubr.msk.f32.mxu0 %vm1171_vm0, %v1172_v1 }
 0x25c   :  { %991 = vmatmul.mubr.msk.f32.gmra.mrb[22].mxu0 %vm517_vm3, %v512_v14 }
 0x25d   :  { %993 = vmatprep.mubr.msk.f32.mxu0 %vm1171_vm0, %v1172_v1 }
 0x260   :  { %994 = vmatmul.mubr.msk.f32.gmra.mrb[24].mxu0 %vm517_vm3, %v513_v15 }
 0x261   :  { %996 = vmatprep.mubr.msk.f32.mxu0 %vm1171_vm0, %v1172_v1 }
 0x264   :  { %997 = vmatmul.mubr.msk.f32.gmra.mrb[26].mxu0 %vm517_vm3, %v514_v16 }
 0x265   :  { %999 = vmatprep.mubr.msk.f32.mxu0 %vm1171_vm0, %v1172_v1 }
 0x268   :  { %1000 = vmatmul.mubr.msk.f32.gmra.mrb[28].mxu0 %vm517_vm3, %v515_v17 }
 0x31b   :  { %v615_v25 = vpop.f32.mrb[12].mxu0 }
 0x31c   :  { %v977_v26 = vpop.f32.mrb[13].mxu0  ;;  %v663_v29 = vmul.f32 %v661_v24, %v615_v25 }
 0x31f   :  { %v620_v28 = vpop.f32.mrb[14].mxu0 }
 0x320   :  { %v668_v30 = vmul.f32 %v666_v27, %v620_v28  ;;  %v980_v1 = vpop.f32.mrb[15].mxu0 }
 0x322   :  { %v669_v32 = vadd.f32 %v668_v30, %v663_v29 }
 0x323   :  { %v625_v33 = vpop.f32.mrb[16].mxu0 }
 0x324   :  { %v674_v34 = vmul.f32 %v672_v31, %v625_v33  ;;  %v983_v35 = vpop.f32.mrb[17].mxu0 }
 0x326   :  { %v675_v36 = vadd.f32 %v674_v34, %v669_v32 }
 0x327   :  { %v630_v0 = vpop.f32.mrb[18].mxu0 }
 0x328   :  { %v680_v38 = vmul.f32 %v678_v37, %v630_v0  ;;  %v986_v39 = vpop.f32.mrb[19].mxu0 }
 0x32a   :  { %v681_v40 = vadd.f32 %v680_v38, %v675_v36 }
 0x32b   :  { %v635_v42 = vpop.f32.mrb[20].mxu0 }
 0x32c   :  { %v686_v43 = vmul.f32 %v684_v41, %v635_v42  ;;  %v989_v44 = vpop.f32.mrb[21].mxu0 }
 0x32e   :  { %v687_v45 = vadd.f32 %v686_v43, %v681_v40 }
 0x32f   :  { %v640_v47 = vpop.f32.mrb[22].mxu0 }
 0x330   :  { %v692_v48 = vmul.f32 %v690_v46, %v640_v47  ;;  %v992_v49 = vpop.f32.mrb[23].mxu0 }
 0x332   :  { %v693_v50 = vadd.f32 %v692_v48, %v687_v45 }
 0x333   :  { %v645_v52 = vpop.f32.mrb[24].mxu0 }
 0x334   :  { %v698_v53 = vmul.f32 %v696_v51, %v645_v52  ;;  %v995_v54 = vpop.f32.mrb[25].mxu0 }
 0x336   :  { %v699_v55 = vadd.f32 %v698_v53, %v693_v50 }
 0x337   :  { %v650_v57 = vpop.f32.mrb[26].mxu0 }
 0x338   :  { %v704_v58 = vmul.f32 %v702_v56, %v650_v57  ;;  %v998_v59 = vpop.f32.mrb[27].mxu0 }
 0x33a   :  { %v705_v60 = vadd.f32 %v704_v58, %v699_v55 }
 0x33b   :  { %v655_v62 = vpop.f32.mrb[28].mxu0 }
 0x33c   :  { %v710_v63 = vmul.f32 %v708_v61, %v655_v62  ;;  %v1001_v2 = vpop.f32.mrb[29].mxu0 }
 0x33e   :  { %v711_v3 = vadd.f32 %v710_v63, %v705_v60 }
 0x340   :  { %1011 = vmatmul.mubr.msk.f32.vlgmr.msra.gmra.mrb[26].mxu1 %vm94_vm1, %v711_v3 }
 0x413   :  { %v792_v5 = vpop.f32.mrb[26].mxu1 }
 0x414   :  { %v793_v6 = vadd.f32 %v844_v4, %v792_v5  ;;  %v1012_v7 = vpop.f32.mrb[27].mxu1 }
 0x416   :  { %796 = vst.msk [vmem:[#allocation8] sm:$0xff] %vm94_vm1, %v793_v6 }
 0x417   :  { %1148 = shalt.err (!%p1145_p0)
}
 0x418   :  { %s1149_s21 = scalar_lea.hbm %s1442_s9, 128 }
 0x419   :  { %p1150_p1 = scmp.ne.s32.totalorder %s1442_s9, %s1149_s21  ;;  %p1153_p2 = scmp.lt.u32.totalorder %s1149_s21, %s1442_s9 }
 0x41b   :  { %p1155_p3 = pnand %p1153_p2, %p1150_p1 }
 0x41d   :  { %1158 = shalt.err (!%p1155_p3)
}
 0x41e   :  { %806 = dma.vmem_to_hbm [thread:$0]  %s804_s25, 128, %s1442_s9, [#allocation4]  }
 0x41f   :  { %1163 = dma.done.wait [#allocation4], 128  }
 0x420   :  { %1164 = vsyncadd [#allocation4], 4294967168 }
 0x421   :  { %810 = vsyncpa [#allocation3], 1 }
 0x422   :  { %811 = vsyncpa [#allocation6], 1 }
 0x423   :  { %812 = vsyncpa [#allocation4], 1 }

</bundles_post_ra>
